<compile_context>
chip_gen: v5e
topology: v5e:2x2
jax: 0.10.0
libtpu: 0.0.40
codegen_flags: <defaults>
</compile_context>

<pallas_src>
import jax
import jax.numpy as jnp
from jax.experimental import pallas as pl
from jax.experimental.pallas import tpu as pltpu


def mlp_kernel(x_ref, w1_ref, b1_ref, w2_ref, b2_ref, w3_ref, b3_ref, o_ref):
    # Layer 1: (TILE_B, IN) @ (IN, 128) on the MXU, f32 accumulate; bias+ReLU in f32.
    h1 = jnp.dot(x_ref[...], w1_ref[...], preferred_element_type=jnp.float32)
    h1 = jnp.maximum(h1 + b1_ref[...], 0.0)
    # Layer 2: cast the activation to the weight dtype (bf16) only for the MXU operand.
    h2 = jnp.dot(h1.astype(w2_ref.dtype), w2_ref[...],
                 preferred_element_type=jnp.float32)
    h2 = jnp.maximum(h2 + b2_ref[...], 0.0)
    # Layer 3 (64 -> 1): VPU multiply + lane reduction instead of a wasteful N=1 MXU matmul.
    # w3 is passed as an f32 (1, 64) row; b3 is an SMEM scalar.
    y = jnp.sum(h2 * w3_ref[...], axis=-1, keepdims=True) + b3_ref[0, 0]
    o_ref[...] = y.astype(o_ref.dtype)


def _round_up(n, m):
    return ((n + m - 1) // m) * m


def _choose_tile_b(batch):
    # Per-step overhead ~0.35us => favor big tiles; cap at 512 rows so f32 h1/h2
    # intermediates stay well inside the v7x scoped-VMEM budget.
    if batch >= 512:
        return 512
    return max(8, _round_up(batch, 8))


def simple_mlp_forward(x, params, *, tile_b=None, use_bf16=True):
    w1, b1, w2, b2, w3, b3 = params
    batch, in_f = x.shape
    h1_f = w1.shape[1]   # 128
    h2_f = w2.shape[1]   # 64

    mxu_dtype = jnp.bfloat16 if use_bf16 else jnp.float32
    x_c = x.astype(mxu_dtype)
    w1_c = w1.astype(mxu_dtype)
    w2_c = w2.astype(mxu_dtype)
    w3_row = w3.reshape(1, h2_f).astype(jnp.float32)   # f32: used on the VPU path
    b1_r = b1.reshape(1, h1_f).astype(jnp.float32)
    b2_r = b2.reshape(1, h2_f).astype(jnp.float32)
    b3_s = b3.reshape(1, 1).astype(jnp.float32)        # SMEM scalar

    tb = tile_b if tile_b is not None else _choose_tile_b(batch)
    b_pad = _round_up(batch, tb)
    if b_pad != batch:
        x_c = jnp.pad(x_c, ((0, b_pad - batch), (0, 0)))
    grid = (b_pad // tb,)

    itemsize = jnp.dtype(mxu_dtype).itemsize
    lane = lambda n: _round_up(n, 128)
    sub = lambda n: _round_up(n, 8)
    # Generous VMEM budget: double-buffered x/out tiles + resident weights/biases
    # + f32 activation headroom; clamp into [16 MiB, 32 MiB] (fits v7x's 64 MiB).
    est = (
        2 * sub(tb) * lane(in_f) * itemsize                                  # x tiles
        + 2 * sub(tb) * lane(1) * 4                                          # out tiles
        + 2 * (sub(in_f) * lane(h1_f) + sub(h1_f) * lane(h2_f)) * itemsize   # w1, w2
        + 2 * (sub(1) * lane(h1_f) + 2 * sub(1) * lane(h2_f)) * 4            # b1, b2, w3
        + sub(tb) * (2 * lane(h1_f) + lane(h2_f)) * 4                        # h1/h2 scratch
    )
    vmem_limit = int(min(max(2 * est + (4 << 20), 16 << 20), 32 << 20))

    flops = 2 * b_pad * (in_f * h1_f + h1_f * h2_f + h2_f)
    bytes_accessed = (
        b_pad * in_f * itemsize
        + (in_f * h1_f + h1_f * h2_f) * itemsize
        + (h1_f + 2 * h2_f + 1) * 4
        + b_pad * 4
    )

    out = pl.pallas_call(
        mlp_kernel,
        out_shape=jax.ShapeDtypeStruct((b_pad, 1), jnp.float32),
        grid=grid,
        in_specs=[
            pl.BlockSpec((tb, in_f), lambda i: (i, 0)),       # x: tiled over batch
            pl.BlockSpec((in_f, h1_f), lambda i: (0, 0)),     # w1: VMEM-resident
            pl.BlockSpec((1, h1_f), lambda i: (0, 0)),        # b1
            pl.BlockSpec((h1_f, h2_f), lambda i: (0, 0)),     # w2
            pl.BlockSpec((1, h2_f), lambda i: (0, 0)),        # b2
            pl.BlockSpec((1, h2_f), lambda i: (0, 0)),        # w3 as (1, 64) row
            pl.BlockSpec(memory_space=pltpu.SMEM),            # b3 scalar in SMEM
        ],
        out_specs=pl.BlockSpec((tb, 1), lambda i: (i, 0)),
        compiler_params=pltpu.CompilerParams(
            dimension_semantics=("parallel",),
            vmem_limit_bytes=vmem_limit,
        ),
        cost_estimate=pl.CostEstimate(
            flops=flops, transcendentals=0, bytes_accessed=bytes_accessed),
    )(x_c, w1_c, b1_r, w2_c, b2_r, w3_row, b3_s)

    return out[:batch]


def init_params(key, input_size=50):
    # Deterministic synthetic init matching the PyTorch module's shapes
    # (weights stored (in_features, out_features) so y = x @ W + b == PyTorch x @ W.T + b).
    k1, k2, k3, k4, k5, k6 = jax.random.split(key, 6)

    def lin(kw, kb, fan_in, fan_out):
        bound = 1.0 / jnp.sqrt(fan_in)
        w = jax.random.uniform(kw, (fan_in, fan_out), jnp.float32, -bound, bound)
        b = jax.random.uniform(kb, (1, fan_out), jnp.float32, -bound, bound)
        return w, b

    w1, b1 = lin(k1, k2, input_size, 128)
    w2, b2 = lin(k3, k4, 128, 64)
    w3, b3 = lin(k5, k6, 64, 1)
    return (w1, b1, w2, b2, w3, b3)


def reference_forward(x, params, *, use_bf16=False):
    w1, b1, w2, b2, w3, b3 = params
    cdt = jnp.bfloat16 if use_bf16 else jnp.float32
    h1 = jnp.dot(x.astype(cdt), w1.astype(cdt), preferred_element_type=jnp.float32) + b1
    h1 = jnp.maximum(h1, 0.0)
    h2 = jnp.dot(h1.astype(cdt), w2.astype(cdt), preferred_element_type=jnp.float32) + b2
    h2 = jnp.maximum(h2, 0.0)
    return jnp.sum(h2 * w3.reshape(1, -1), axis=-1, keepdims=True) + b3


if __name__ == "__main__":
    key = jax.random.PRNGKey(0)
    kx, kp = jax.random.split(key)
    input_size = 50
    params = init_params(kp, input_size)

    # Small batch (single grid step).
    B = 8
    x = jax.random.normal(kx, (B, input_size), jnp.float32)
    out = jax.block_until_ready(simple_mlp_forward(x, params))
    assert out.shape == (B, 1)
    assert jnp.allclose(out, reference_forward(x, params, use_bf16=True),
                        atol=1e-4, rtol=1e-4)
    assert jnp.allclose(out, reference_forward(x, params, use_bf16=False),
                        atol=5e-2, rtol=5e-2)

    # Larger, non-multiple-of-tile batch: exercises the batch grid, padding and
    # VMEM-resident weights across grid steps.
    B2 = 1000
    x2 = jax.random.normal(jax.random.PRNGKey(1), (B2, input_size), jnp.float32)
    out2 = jax.block_until_ready(simple_mlp_forward(x2, params, tile_b=256))
    assert out2.shape == (B2, 1)
    assert jnp.allclose(out2, reference_forward(x2, params, use_bf16=True),
                        atol=1e-4, rtol=1e-4)

    print("KERNEL_OK")
</pallas_src>

<mosaic_0001>
module attributes {stable_mosaic.version = 11 : i64} {
  func.func @mlp_kernel(%arg0: i32, %arg1: memref<8x50xbf16, #tpu.memory_space<vmem>>, %arg2: memref<50x128xbf16, #tpu.memory_space<vmem>>, %arg3: memref<1x128xf32, #tpu.memory_space<vmem>>, %arg4: memref<128x64xbf16, #tpu.memory_space<vmem>>, %arg5: memref<1x64xf32, #tpu.memory_space<vmem>>, %arg6: memref<1x64xf32, #tpu.memory_space<vmem>>, %arg7: memref<1x1xf32, #tpu.memory_space<smem>>, %arg8: memref<8x1xf32, #tpu.memory_space<vmem>>) attributes {dimension_semantics = [#tpu.dimension_semantics<parallel>], iteration_bounds = array<i64: 1>, scalar_prefetch = 0 : i64, scratch_operands = 0 : i64, tpu.core_type = #tpu.core_type<tc>, window_params = [{transform_indices = @transform_0, window_bounds = array<i64: 8, 50>}, {pipeline_mode = #tpu.pipeline_mode<synchronous>, transform_indices = @transform_1, window_bounds = array<i64: 50, 128>}, {pipeline_mode = #tpu.pipeline_mode<synchronous>, transform_indices = @transform_2, window_bounds = array<i64: 1, 128>}, {pipeline_mode = #tpu.pipeline_mode<synchronous>, transform_indices = @transform_3, window_bounds = array<i64: 128, 64>}, {pipeline_mode = #tpu.pipeline_mode<synchronous>, transform_indices = @transform_4, window_bounds = array<i64: 1, 64>}, {pipeline_mode = #tpu.pipeline_mode<synchronous>, transform_indices = @transform_5, window_bounds = array<i64: 1, 64>}, {transform_indices = @transform_6, window_bounds = array<i64: 1, 1>}, {transform_indices = @transform_7, window_bounds = array<i64: 8, 1>}]} {
    %c0 = arith.constant 0 : index
    %c0_0 = arith.constant 0 : index
    %0 = vector.load %arg1[%c0, %c0_0] : memref<8x50xbf16, #tpu.memory_space<vmem>>, vector<8x50xbf16>
    %c0_1 = arith.constant 0 : index
    %c0_2 = arith.constant 0 : index
    %1 = vector.load %arg2[%c0_1, %c0_2] : memref<50x128xbf16, #tpu.memory_space<vmem>>, vector<50x128xbf16>
    %cst = arith.constant dense<0.000000e+00> : vector<8x128xf32>
    %2 = tpu.matmul %0, %1, %cst {dimension_numbers = #tpu.dot_dimension_numbers<[1], [0], [0], [1], [0, 0, 1, 1], [], []>} : vector<8x50xbf16>, vector<50x128xbf16>, vector<8x128xf32> -> vector<8x128xf32>
    %c0_3 = arith.constant 0 : index
    %c0_4 = arith.constant 0 : index
    %3 = vector.load %arg3[%c0_3, %c0_4] : memref<1x128xf32, #tpu.memory_space<vmem>>, vector<1x128xf32>
    %4 = vector.broadcast %3 : vector<1x128xf32> to vector<8x128xf32>
    %5 = arith.addf %2, %4 : vector<8x128xf32>
    %cst_5 = arith.constant 0.000000e+00 : f32
    %6 = vector.broadcast %cst_5 : f32 to vector<8x128xf32>
    %7 = arith.maximumf %5, %6 : vector<8x128xf32>
    %8 = arith.truncf %7 : vector<8x128xf32> to vector<8x128xbf16>
    %c0_6 = arith.constant 0 : index
    %c0_7 = arith.constant 0 : index
    %9 = vector.load %arg4[%c0_6, %c0_7] : memref<128x64xbf16, #tpu.memory_space<vmem>>, vector<128x64xbf16>
    %cst_8 = arith.constant dense<0.000000e+00> : vector<8x64xf32>
    %10 = tpu.matmul %8, %9, %cst_8 {dimension_numbers = #tpu.dot_dimension_numbers<[1], [0], [0], [1], [0, 0, 1, 1], [], []>} : vector<8x128xbf16>, vector<128x64xbf16>, vector<8x64xf32> -> vector<8x64xf32>
    %c0_9 = arith.constant 0 : index
    %c0_10 = arith.constant 0 : index
    %11 = vector.load %arg5[%c0_9, %c0_10] : memref<1x64xf32, #tpu.memory_space<vmem>>, vector<1x64xf32>
    %12 = vector.broadcast %11 : vector<1x64xf32> to vector<8x64xf32>
    %13 = arith.addf %10, %12 : vector<8x64xf32>
    %cst_11 = arith.constant 0.000000e+00 : f32
    %14 = vector.broadcast %cst_11 : f32 to vector<8x64xf32>
    %15 = arith.maximumf %13, %14 : vector<8x64xf32>
    %c0_12 = arith.constant 0 : index
    %c0_13 = arith.constant 0 : index
    %16 = vector.load %arg6[%c0_12, %c0_13] : memref<1x64xf32, #tpu.memory_space<vmem>>, vector<1x64xf32>
    %17 = vector.broadcast %16 : vector<1x64xf32> to vector<8x64xf32>
    %18 = arith.mulf %15, %17 : vector<8x64xf32>
    %cst_14 = arith.constant dense<0.000000e+00> : vector<8xf32>
    %19 = vector.multi_reduction <add>, %18, %cst_14 [1] : vector<8x64xf32> to vector<8xf32>
    %20 = vector.shape_cast %19 : vector<8xf32> to vector<8x1xf32>
    %c0_15 = arith.constant 0 : index
    %c0_16 = arith.constant 0 : index
    %21 = memref.load %arg7[%c0_15, %c0_16] : memref<1x1xf32, #tpu.memory_space<smem>>
    %22 = vector.broadcast %21 : f32 to vector<8x1xf32>
    %23 = arith.addf %20, %22 : vector<8x1xf32>
    %c0_17 = arith.constant 0 : index
    %c0_18 = arith.constant 0 : index
    %24 = vector.load %arg8[%c0_17, %c0_18] : memref<8x1xf32, #tpu.memory_space<vmem>>, vector<8x1xf32>
    tpu.vector_store %arg8[%c0_17, %c0_18], %23 {strides = array<i32>} : memref<8x1xf32, #tpu.memory_space<vmem>>, vector<8x1xf32>,
    return
  }
  func.func @transform_0(%arg0: i32) -> (i32, i32) {
    %c0_i32 = arith.constant 0 : i32
    %c0_i32_0 = arith.constant 0 : i32
    return %arg0, %c0_i32 : i32, i32
  }
  func.func @transform_1(%arg0: i32) -> (i32, i32) {
    %c0_i32 = arith.constant 0 : i32
    %c0_i32_0 = arith.constant 0 : i32
    %c0_i32_1 = arith.constant 0 : i32
    return %c0_i32, %c0_i32_0 : i32, i32
  }
  func.func @transform_2(%arg0: i32) -> (i32, i32) {
    %c0_i32 = arith.constant 0 : i32
    %c0_i32_0 = arith.constant 0 : i32
    %c0_i32_1 = arith.constant 0 : i32
    return %c0_i32, %c0_i32_0 : i32, i32
  }
  func.func @transform_3(%arg0: i32) -> (i32, i32) {
    %c0_i32 = arith.constant 0 : i32
    %c0_i32_0 = arith.constant 0 : i32
    %c0_i32_1 = arith.constant 0 : i32
    return %c0_i32, %c0_i32_0 : i32, i32
  }
  func.func @transform_4(%arg0: i32) -> (i32, i32) {
    %c0_i32 = arith.constant 0 : i32
    %c0_i32_0 = arith.constant 0 : i32
    %c0_i32_1 = arith.constant 0 : i32
    return %c0_i32, %c0_i32_0 : i32, i32
  }
  func.func @transform_5(%arg0: i32) -> (i32, i32) {
    %c0_i32 = arith.constant 0 : i32
    %c0_i32_0 = arith.constant 0 : i32
    %c0_i32_1 = arith.constant 0 : i32
    return %c0_i32, %c0_i32_0 : i32, i32
  }
  func.func @transform_6(%arg0: i32) -> (i32, i32) {
    %c0_i32 = arith.constant 0 : i32
    %c0_i32_0 = arith.constant 0 : i32
    %c0_i32_1 = arith.constant 0 : i32
    return %c0_i32, %c0_i32_0 : i32, i32
  }
  func.func @transform_7(%arg0: i32) -> (i32, i32) {
    %c0_i32 = arith.constant 0 : i32
    %c0_i32_0 = arith.constant 0 : i32
    return %arg0, %c0_i32 : i32, i32
  }
}

</mosaic_0001>

<bundles_post_ra>
// kernel: tpu_custom_call.1
= control target key start
LH: loop header
LB: loop body
LE: loop exit
PB: predicated region body
PF: predicated region fallthrough
CT: control target
= control target key end

     0   :  { %vm65_vm0 = vcmask 1040384   ;;  %vm61_vm1 = vcmask 408576   ;;  %vm171_vm2 = vcmask 523264   ;;  %vm178_vm3 = vcmask 7168   ;;  %s337_s1 = inlined_call_operand.vmem [shape: bf16[50,128], index: 1, kind: input, shape index: {}]   ;;  %s338_s3 = inlined_call_operand.vmem [shape: bf16[128,64], index: 3, kind: input, shape index: {}]   ;;  %s339_s2 = inlined_call_operand.vmem [shape: f32[1,128], index: 2, kind: input, shape index: {}]   ;;  %s340_s0 = inlined_call_operand.vmem [shape: bf16[8,50], index: 0, kind: input, shape index: {}]   ;;  %s341_s4 = inlined_call_operand.vmem [shape: f32[1,64], index: 4, kind: input, shape index: {}]   ;;  %s342_s5 = inlined_call_operand.vmem [shape: f32[1,64], index: 5, kind: input, shape index: {}]   ;;  %s343_s6 = inlined_call_operand.<no memory space> [shape: f32[1,1], index: 6, kind: input, shape index: {}]   ;;  %s344_s7 = inlined_call_operand.vmem [shape: f32[8,1], index: 7, kind: output, shape index: {}]  }
   0x1   :  { %v35_v0 = vld [vmem:[%s337_s1 + $0x18] sm:$0x1]  ;;  %v238_v4 = vld [vmem:[%s338_s3 + $0x30] sm:$0xff]  ;;  %v237_v7 = vld [vmem:[%s338_s3 + $0x28] sm:$0xff]  ;;  %v176_v30 = vstv %s343_s6 }
   0x2   :  { %v53_v1 = vunpack.c.l.b16 %v35_v0  ;;  %v239_v2 = vld [vmem:[%s338_s3 + $0x38] sm:$0xff]  ;;  %v231_v6 = vld [vmem:[%s337_s1 + $0x10] sm:$0xff]  ;;  %v230_v8 = vld [vmem:[%s337_s1 + $0x8] sm:$0xff] }
   0x3   :  { %152 = vmatpush.bf16.msra.mxu1 %v239_v2  ;;  %v236_v9 = vld [vmem:[%s338_s3 + $0x20] sm:$0xff]  ;;  %v235_v11 = vld [vmem:[%s338_s3 + $0x18] sm:$0xff]  ;;  %v234_v13 = vld [vmem:[%s338_s3 + $0x10] sm:$0xff] }
   0x4   :  { %v57_v3 = vpack.c.b16 %v53_v1, %v53_v1  ;;  %v229_v10 = vld [vmem:[%s337_s1] sm:$0xff]  ;;  %v233_v14 = vld [vmem:[%s338_s3 + $0x8] sm:$0xff] }
   0x5   :  { %v28_v12 = vld [vmem:[%s340_s0] sm:$0xf] }
   0x6   :  { %v67_v5 = vsel %vm65_vm0, %v57_v3, 0  ;;  %v232_v15 = vld [vmem:[%s338_s3] sm:$0xff] }
   0x7   :  { %73 = vmatpush.bf16.msra.mxu0 %v67_v5  ;;  %153 = vmatpush.bf16.msra.mxu1 %v238_v4  ;;  %v240_v16 = vld [vmem:[%s339_s2] ss:$0 sm:$0xff] }
   0x8   :  { %v241_v22 = vld [vmem:[%s341_s4] ss:$0 sm:$0xff] }
   0x9   :  { %v242_v25 = vld [vmem:[%s342_s5] ss:$0 sm:$0xff] }
   0xb   :  { %74 = vmatpush.bf16.msra.mxu0 %v231_v6  ;;  %154 = vmatpush.bf16.msra.mxu1 %v237_v7 }
   0xf   :  { %75 = vmatpush.bf16.msra.mxu0 %v230_v8  ;;  %155 = vmatpush.bf16.msra.mxu1 %v236_v9 }
  0x13   :  { %76 = vmatpush.bf16.msra.mxu0 %v229_v10  ;;  %156 = vmatpush.bf16.msra.mxu1 %v235_v11 }
  0x16   :  { %196 = vmatmul.msk.bf16.vlgmr.msra.gmra.mxu0 %vm61_vm1, %v28_v12 }
  0x17   :  { %157 = vmatpush.bf16.msra.mxu1 %v234_v13 }
  0x1b   :  { %158 = vmatpush.bf16.msra.mxu1 %v233_v14 }
  0x1f   :  { %159 = vmatpush.bf16.msra.mxu1 %v232_v15 }
  0x93   :  { %v78_v17 = vpop.f32.mrf.mxu0 }
  0x94   :  { %v79_v18 = vadd.f32 %v240_v16, %v78_v17 }
  0x96   :  { %v82_v19 = vmax.f32 %v79_v18, 0.0 }
  0x98   :  { %v83_v20 = vpack.c.bf16 %v82_v19, %v82_v19 }
  0x9a   :  { %160 = vmatmul.bf16.vlgmr.msra.gmra.mxu1 %v83_v20 }
  0x9b   :  { %v80_v21 = vpop.f32.mrf.mxu0 }
 0x117   :  { %v161_v23 = vpop.f32.mrf.mxu1 }
 0x118   :  { %v162_v24 = vadd.f32 %v241_v22, %v161_v23 }
 0x11a   :  { %v165_v26 = vmax.f32 %v162_v24, 0.0 }
 0x11c   :  { %v170_v27 = vmul.f32 %v242_v25, %v165_v26 }
 0x11e   :  { %v172_v28 = vsel %vm171_vm2, %v170_v27, 0.0 }
 0x11f   :  { %v163_v29 = vpop.f32.mrf.mxu1  ;;  %173 = vadd.xlane.f32.xlu0 %v172_v28 }
 0x192   :  { %v174_v31 = vpop.xlane.xlu0 %173 }
 0x193   :  { %v177_v32 = vadd.f32 %v176_v30, %v174_v31 }
 0x195   :  { %179 = vst.msk [vmem:[%s344_s7] sm:$0xff] %vm178_vm3, %v177_v32 }

</bundles_post_ra>
